<compile_context>
chip_gen: v7x
topology: tpu7x:2x2x1
jax: 0.10.0
libtpu: 0.0.40
codegen_flags: <defaults>
</compile_context>

<pallas_src>
import jax
import jax.numpy as jnp
from jax.experimental import pallas as pl
from jax.experimental.pallas import tpu as pltpu


def _embed_kernel(x_ref, w_ref, pos_ref, o_ref):
    # x_ref:   (1, tile_np, K_pad)   bf16 flattened patches for this (tile, b)
    # w_ref:   (K_pad, hidden)       bf16 conv weight (reshaped + transposed)
    # pos_ref: (tile_np, hidden)     bf16 positional embedding + folded bias
    # o_ref:   (1, tile_np, hidden)  out_dtype (bf16 by default)
    acc = jnp.dot(x_ref[0], w_ref[...], preferred_element_type=jnp.float32)
    o_ref[0] = (acc + pos_ref[...].astype(jnp.float32)).astype(o_ref.dtype)


def siglip_vision_embedding(images, conv_w, conv_b, pos_table, patch_size,
                            *, patch_tile=512, out_dtype=jnp.bfloat16):
    """images: (B, C, H, W); conv_w: (hidden, C, P, P); conv_b: (hidden,);
    pos_table: (num_patches, hidden).  Returns (B, num_patches, hidden)."""
    B, C, H, W = images.shape
    P = patch_size
    hidden = conv_w.shape[0]
    assert H % P == 0 and W % P == 0, "image size must be divisible by patch"
    nph, npw = H // P, W // P
    num_patches = nph * npw
    assert pos_table.shape == (num_patches, hidden)
    K = C * P * P

    # --- glue: extract non-overlapping patches in (C, kh, kw) order (matches
    # PyTorch Conv2d weight layout) and cast to bf16; XLA fuses transpose+cast
    # into a single pass over the image (free cast if images already bf16).
    x = images.reshape(B, C, nph, P, npw, P)
    x = jnp.transpose(x, (0, 2, 4, 1, 3, 5)).reshape(B, num_patches, K)
    x = x.astype(jnp.bfloat16)

    # Pad K to a multiple of 128 (zeros don't change the matmul) so patch /
    # weight tiles are lane-aligned and MXU passes are unmasked.
    K_pad = 128 * pl.cdiv(K, 128)
    if K_pad != K:
        x = jnp.pad(x, ((0, 0), (0, 0), (0, K_pad - K)))

    w_mat = conv_w.reshape(hidden, K).T.astype(jnp.bfloat16)      # (K, hidden)
    if K_pad != K:
        w_mat = jnp.pad(w_mat, ((0, K_pad - K), (0, 0)))          # (K_pad, hidden)

    # Fold the conv bias into the positional table (one fewer input stream);
    # sum in f32, then store bf16 to halve its HBM traffic.
    pos_b = (pos_table.astype(jnp.float32)
             + conv_b.astype(jnp.float32)[None, :]).astype(jnp.bfloat16)

    # --- patch-dim tiling.
    if B == 1 and num_patches >= 16:
        # v7x: both grid axes are "parallel", so tiles shard across the two
        # TensorCores — pick an EVEN number of balanced, 8-aligned tiles.
        n_tiles = max(2, pl.cdiv(num_patches, patch_tile))
        n_tiles += n_tiles % 2
        tile_np = 8 * pl.cdiv(pl.cdiv(num_patches, n_tiles), 8)
    elif num_patches <= patch_tile:
        tile_np = num_patches                      # full extent (always legal)
    else:
        tile_np = max(8, (patch_tile // 8) * 8)
    # Grid: patch tiles outer, batch inner -> pos tile DMA'd once per patch
    # tile; weight DMA'd once for the whole grid.
    grid = (pl.cdiv(num_patches, tile_np), B)

    out_itemsize = jnp.dtype(out_dtype).itemsize
    cost = pl.CostEstimate(
        flops=2 * B * num_patches * K_pad * hidden,
        transcendentals=0,
        bytes_accessed=int(
            x.size * x.dtype.itemsize                 # bf16 patches (per batch)
            + w_mat.size * w_mat.dtype.itemsize       # bf16 weight, read once
            + pos_b.size * pos_b.dtype.itemsize       # bf16 pos+bias, read once
            + B * num_patches * hidden * out_itemsize),
    )

    out = pl.pallas_call(
        _embed_kernel,
        out_shape=jax.ShapeDtypeStruct((B, num_patches, hidden), out_dtype),
        grid_spec=pltpu.PrefetchScalarGridSpec(
            num_scalar_prefetch=0,
            grid=grid,
            in_specs=[
                pl.BlockSpec((1, tile_np, K_pad), lambda p, b: (b, p, 0)),
                pl.BlockSpec((K_pad, hidden), lambda p, b: (0, 0)),
                pl.BlockSpec((tile_np, hidden), lambda p, b: (p, 0)),
            ],
            out_specs=pl.BlockSpec((1, tile_np, hidden),
                                   lambda p, b: (b, p, 0)),
        ),
        compiler_params=pltpu.CompilerParams(
            dimension_semantics=("parallel", "parallel"),
            vmem_limit_bytes=32 * 1024 * 1024),
        cost_estimate=cost,
    )(x, w_mat, pos_b)
    return out


def _reference(images, conv_w, conv_b, pos_table, P):
    B, C, H, W = images.shape
    HID = conv_w.shape[0]
    nph, npw = H // P, W // P
    num_patches = nph * npw
    K = C * P * P
    xr = images.reshape(B, C, nph, P, npw, P)
    xr = jnp.transpose(xr, (0, 2, 4, 1, 3, 5)).reshape(B, num_patches, K)
    ref = xr @ conv_w.reshape(HID, K).T + conv_b[None, None, :]
    return ref + pos_table[None, :, :]


if __name__ == "__main__":
    key = jax.random.PRNGKey(0)
    k_img, k_w, k_b, k_pos, k_img2, k_pos2 = jax.random.split(key, 6)

    # --- test 1: small config consistent with the module ---------------------
    #   num_channels=3, image_size=16, patch_size=4 -> num_patches=16,
    #   hidden_size=32, batch=2.
    B, C, IMG, P, HID = 2, 3, 16, 4, 32
    NUM_PATCHES = (IMG // P) ** 2

    images = jax.random.normal(k_img, (B, C, IMG, IMG), dtype=jnp.float32)
    conv_w = jax.random.normal(k_w, (HID, C, P, P), dtype=jnp.float32) * 0.02
    conv_b = jax.random.normal(k_b, (HID,), dtype=jnp.float32) * 0.02
    pos_table = jax.random.normal(k_pos, (NUM_PATCHES, HID),
                                  dtype=jnp.float32) * 0.02

    out = siglip_vision_embedding(images, conv_w, conv_b, pos_table, P)
    out = jax.block_until_ready(out)
    ref = _reference(images, conv_w, conv_b, pos_table, P)

    assert out.shape == (B, NUM_PATCHES, HID)
    assert out.dtype == jnp.bfloat16
    assert jnp.allclose(out.astype(jnp.float32), ref, atol=2e-2, rtol=2e-2)

    # --- test 2: batch 1 + ragged patch tiling (num_patches not a multiple of
    # the tile) exercises the v7x balanced-split branch and Pallas block
    # padding on the last tile.  image_size=20, patch=4 -> 25 patches.
    B2, IMG2 = 1, 20
    NP2 = (IMG2 // P) ** 2
    images2 = jax.random.normal(k_img2, (B2, C, IMG2, IMG2), dtype=jnp.float32)
    pos2 = jax.random.normal(k_pos2, (NP2, HID), dtype=jnp.float32) * 0.02

    out2 = siglip_vision_embedding(images2, conv_w, conv_b, pos2, P,
                                   patch_tile=16)
    out2 = jax.block_until_ready(out2)
    ref2 = _reference(images2, conv_w, conv_b, pos2, P)

    assert out2.shape == (B2, NP2, HID)
    assert jnp.allclose(out2.astype(jnp.float32), ref2, atol=2e-2, rtol=2e-2)

    print("KERNEL_OK")
</pallas_src>

<mosaic_0001>
module attributes {stable_mosaic.version = 11 : i64} {
  func.func @_embed_kernel(%arg0: i32, %arg1: i32, %arg2: memref<1x16x128xbf16, #tpu.memory_space<vmem>>, %arg3: memref<128x32xbf16, #tpu.memory_space<vmem>>, %arg4: memref<16x32xbf16, #tpu.memory_space<vmem>>, %arg5: memref<1x16x32xbf16, #tpu.memory_space<vmem>>) attributes {dimension_semantics = [#tpu.dimension_semantics<parallel>, #tpu.dimension_semantics<parallel>], iteration_bounds = array<i64: 1, 2>, scalar_prefetch = 0 : i64, scratch_operands = 0 : i64, tpu.core_type = #tpu.core_type<tc>, window_params = [{transform_indices = @transform_0, window_bounds = array<i64: 1, 16, 128>}, {pipeline_mode = #tpu.pipeline_mode<synchronous>, transform_indices = @transform_1, window_bounds = array<i64: 128, 32>}, {transform_indices = @transform_2, window_bounds = array<i64: 16, 32>}, {transform_indices = @transform_3, window_bounds = array<i64: 1, 16, 32>}]} {
    %c0 = arith.constant 0 : index
    %c0_0 = arith.constant 0 : index
    %c0_1 = arith.constant 0 : index
    %0 = vector.load %arg2[%c0, %c0_0, %c0_1] : memref<1x16x128xbf16, #tpu.memory_space<vmem>>, vector<1x16x128xbf16>
    %1 = vector.shape_cast %0 : vector<1x16x128xbf16> to vector<16x128xbf16>
    %c0_2 = arith.constant 0 : index
    %c0_3 = arith.constant 0 : index
    %2 = vector.load %arg3[%c0_2, %c0_3] : memref<128x32xbf16, #tpu.memory_space<vmem>>, vector<128x32xbf16>
    %cst = arith.constant dense<0.000000e+00> : vector<16x32xf32>
    %3 = tpu.matmul %1, %2, %cst {dimension_numbers = #tpu.dot_dimension_numbers<[1], [0], [0], [1], [0, 0, 1, 1], [], []>} : vector<16x128xbf16>, vector<128x32xbf16>, vector<16x32xf32> -> vector<16x32xf32>
    %c0_4 = arith.constant 0 : index
    %c0_5 = arith.constant 0 : index
    %4 = vector.load %arg4[%c0_4, %c0_5] : memref<16x32xbf16, #tpu.memory_space<vmem>>, vector<16x32xbf16>
    %5 = arith.extf %4 : vector<16x32xbf16> to vector<16x32xf32>
    %6 = arith.addf %3, %5 : vector<16x32xf32>
    %7 = arith.truncf %6 : vector<16x32xf32> to vector<16x32xbf16>
    %c0_6 = arith.constant 0 : index
    %c0_7 = arith.constant 0 : index
    %c0_8 = arith.constant 0 : index
    %8 = vector.load %arg5[%c0_6, %c0_7, %c0_8] : memref<1x16x32xbf16, #tpu.memory_space<vmem>>, vector<1x16x32xbf16>
    %9 = vector.shape_cast %8 : vector<1x16x32xbf16> to vector<16x32xbf16>
    %10 = vector.shape_cast %7 : vector<16x32xbf16> to vector<1x16x32xbf16>
    tpu.vector_store %arg5[%c0_6, %c0_7, %c0_8], %10 {strides = array<i32>} : memref<1x16x32xbf16, #tpu.memory_space<vmem>>, vector<1x16x32xbf16>,
    return
  }
  func.func @transform_0(%arg0: i32, %arg1: i32) -> (i32, i32, i32) {
    %c0_i32 = arith.constant 0 : i32
    %c0_i32_0 = arith.constant 0 : i32
    return %arg1, %arg0, %c0_i32 : i32, i32, i32
  }
  func.func @transform_1(%arg0: i32, %arg1: i32) -> (i32, i32) {
    %c0_i32 = arith.constant 0 : i32
    %c0_i32_0 = arith.constant 0 : i32
    %c0_i32_1 = arith.constant 0 : i32
    return %c0_i32, %c0_i32_0 : i32, i32
  }
  func.func @transform_2(%arg0: i32, %arg1: i32) -> (i32, i32) {
    %c0_i32 = arith.constant 0 : i32
    %c0_i32_0 = arith.constant 0 : i32
    return %arg0, %c0_i32 : i32, i32
  }
  func.func @transform_3(%arg0: i32, %arg1: i32) -> (i32, i32, i32) {
    %c0_i32 = arith.constant 0 : i32
    %c0_i32_0 = arith.constant 0 : i32
    return %arg1, %arg0, %c0_i32 : i32, i32, i32
  }
}

</mosaic_0001>

<bundles_post_ra>
// kernel: tpu_custom_call.1
= control target key start
LH: loop header
LB: loop body
LE: loop exit
PB: predicated region body
PF: predicated region fallthrough
CT: control target
= control target key end

     0   :  { %8 = vsyncpa [#allocation3], 0  ;;  %s838_s0 = inlined_call_operand.vmem [shape: bf16[2,16,128], index: 0, kind: input, shape index: {}]   ;;  %s839_s1 = inlined_call_operand.vmem [shape: bf16[128,32], index: 1, kind: input, shape index: {}]   ;;  %s840_s2 = inlined_call_operand.vmem [shape: bf16[16,32], index: 2, kind: input, shape index: {}]   ;;  %s841_s3 = inlined_call_operand.hbm [shape: bf16[2,16,32], index: 3, kind: output, shape index: {}]  }
   0x1   :  { %10 = vsyncpa [#allocation3 + $0x1], 0  ;;  %s696_s12 = smov 0   ;;  %s698_s13 = smov 0  }
   0x2   :  { %s700_s14 = smov 0   ;;  %s702_s15 = smov 0  }
   0x3   :  { %s704_s16 = smov 0   ;;  %s706_s17 = smov 0  }
   0x4 LB: > { %s461_s18 = sadd.s32 4294967295, %s669_s17   ;;  %s462_s19 = sadd.s32 4294967294, %s669_s17   ;;  %s669_s17 = sphi %s706_s17, %s16_s17   ;;  %s665_s16 = sphi %s704_s16, %s848_s16   ;;  %s661_s15 = sphi %s702_s15, %s847_s15   ;;  %s657_s14 = sphi %s700_s14, %s846_s14   ;;  %s653_s13 = sphi %s698_s13, %s845_s13   ;;  %s649_s12 = sphi %s696_s12, %s844_s12  }
   0x5   : > { %s25_s20 = sadd.s32 1, %s665_s16  ;;  %s112_s21 = sadd.s32 1, %s657_s14 }
   0x6   : > { %p26_p0 = scmp.ge.s32.totalorder %s25_s20, 2  ;;  %p122_p1 = scmp.ne.s32.totalorder %s657_s14, %s653_s13 }
   0x7   : > { %p123_p2 = scmp.eq.s32.totalorder %s461_s18, 1  ;;  %p128_p3 = scmp.ne.s32.totalorder %s653_s13, %s649_s12 }
   0x8   : > { %s850_s20 = smov (%p26_p0, %s25_s20), 0  ;;  %p129_p5 = scmp.eq.s32.totalorder %s462_s19, 1 }
   0x9   : > { %p736_p4 = por %p123_p2, %p122_p1  ;;  %s107_s23 = ssub.s32 %s665_s16, %s850_s20 }
   0xa   : > { %p466_p6 = scmp.ge.s32.totalorder %s669_s17, 1  ;;  %p110_p7 = scmp.eq.s32.totalorder %s107_s23, 0 }
   0xb   : > { %p743_p8 = por %p129_p5, %p128_p3  ;;  %p172_p9 = scmp.lt.s32.totalorder %s669_s17, 3 }
   0xc   : > { %s749_s25 = scalar_select %p110_p7, %s657_s14, %s112_s21  }
   0xd   : > { %p173_p10 = pnand %p466_p6, %p172_p9 }
   0xe   : > { %v582_v0 = vld [vmem:[%s839_s1] sm:$0xff] (!%p173_p10)   ;;  %v671_v1 = vmov (!%p173_p10), 0.0   ;;  %v583_v2 = vld [vmem:[%s839_s1 + $0x8] sm:$0xff] (!%p173_p10)   ;;  %vm672_vm0 = vmmov (!%p173_p10), 0   ;;  %p206_p11 = scmp.lt.s32.totalorder (!%p173_p10), %s661_s15, 1  ;;  %v584_v3 = vld [vmem:[%s839_s1 + $0x10] sm:$0xff] (!%p173_p10)  }
   0xf   : > { %176 = sbr.rel (%p173_p10) target bundleno = 280 (0x118), region = 32  ;;  %503 = vmatprep.subr.bf16.mxu0 (!%p173_p10), %v671_v1  ;;  %519 = vmatprep.mubr.msk.bf16.mxu0 (!%p173_p10), %vm672_vm0, %v671_v1  ;;  %v585_v4 = vld [vmem:[%s839_s1 + $0x18] sm:$0xff] (!%p173_p10)   ;;  %v586_v5 = vld [vmem:[%s839_s1 + $0x20] sm:$0xff] (!%p173_p10)   ;;  %v587_v6 = vld [vmem:[%s839_s1 + $0x28] sm:$0xff] (!%p173_p10)   ;;  %s489_s10 = sshll.u32 (!%p173_p10), %s661_s15, 7  ;;  %vm348_vm1 = vcmask (!%p173_p10), 257024  }
  0x10   : > { %504 = vmatpush3.bf16.msra.mxu0 (!%p173_p10), %v582_v0  ;;  %v588_v7 = vld [vmem:[%s839_s1 + $0x30] sm:$0xff] (!%p173_p10)   ;;  %v589_v8 = vld [vmem:[%s839_s1 + $0x38] sm:$0xff] (!%p173_p10)   ;;  %v491_v10 = vld [vmem:[%s840_s2] sm:$0xff] (!%p173_p10)   ;;  %s790_s18 = scalar_lea.hbm (!%p173_p10), %s841_s3, %s489_s10  ;;  %s673_s21 = smov (!%p173_p10), [#allocation2]  }
  0x11   : > { %505 = vmatprep.subr.bf16.mxu0 (!%p173_p10), %v671_v1  ;;  %v492_v11 = vunpack.c.l.bf16 (!%p173_p10), %v491_v10  ;;  %v493_v12 = vunpack.c.h.bf16 (!%p173_p10), %v491_v10  ;;  %s595_s23 = sshll.u32 (!%p173_p10), %s673_s21, 4  ;;  %s596_s23 = int_to_ptr.vmem [resolvable:$false] %s595_s23 }
  0x12   : > { %s597_s26 = scalar_lea.vmem (!%p173_p10), %s596_s23, 256 }
  0x14   : > { %506 = vmatpush3.bf16.msra.mxu0 (!%p173_p10), %v583_v2 }
  0x15   : > { %507 = vmatprep.subr.bf16.mxu0 (!%p173_p10), %v671_v1 }
  0x16   : > { %s207_s30 = scalar_select %p206_p11, %s661_s15, 1 }
  0x18   : > { %s486_s6 = sshll.u32 %s207_s30, 3  ;;  %508 = vmatpush3.bf16.msra.mxu0 %v584_v3  ;;  %s202_s30 = sand.u32 1, %s653_s13  }
  0x19   : > { %s213_s9 = scalar_lea.vmem %s838_s0, %s486_s6  ;;  %509 = vmatprep.subr.bf16.mxu0 %v671_v1  ;;  %s467_s6 = sshll.u32 %s202_s30, 3 }
  0x1a   : > { %v590_v9 = vld [vmem:[%s213_s9] sm:$0xff]   ;;  %s204_s7 = scalar_lea.vmem [#allocation2], %s467_s6  ;;  %s792_s19 = scalar_lea.sflag [#allocation3], %s202_s30 }
  0x1b   : > { %s367_s8 = sshll.u32 %s204_s7, 4  ;;  %s785_s8 = int_to_ptr.vmem [resolvable:$true] %s367_s8 }
  0x1c   : > { %510 = vmatpush3.bf16.msra.mxu0 %v585_v4  ;;  %s591_s15 = scalar_lea.vmem %s785_s8, 128  ;;  %p598_p1 = scmp.lt.s32.totalorder %s785_s8, %s596_s23 }
  0x1d   : > { %511 = vmatprep.subr.bf16.mxu0 %v671_v1  ;;  %p592_p12 = scmp.ne.s32.totalorder %s785_s8, %s591_s15  ;;  %p599_p2 = scmp.lt.s32.totalorder %s597_s26, %s591_s15 }
  0x1f   : > { %p593_p13 = pnand %p592_p12, %p736_p4  ;;  %p600_p3 = por %p599_p2, %p598_p1 }
  0x20   : > { %512 = vmatpush3.bf16.msra.mxu0 %v586_v5 }
  0x21   : > { %513 = vmatprep.subr.bf16.mxu0 %v671_v1  ;;  %p594_p0 = pneg %p593_p13 }
  0x23   : > { %p601_p5 = pnand %p600_p3, %p594_p0 }
  0x24   : > { %514 = vmatpush3.bf16.msra.mxu0 %v587_v6 }
  0x25   : > { %515 = vmatprep.subr.bf16.mxu0 %v671_v1 }
  0x28   : > { %516 = vmatpush3.bf16.msra.mxu0 %v588_v7 }
  0x29   : > { %517 = vmatprep.subr.bf16.mxu0 %v671_v1 }
  0x2c   : > { %518 = vmatpush3.bf16.msra.mxu0 %v589_v8 }
  0x2f   : > { %520 = vmatmul.mubr.bf16.vlgmr.msra.gmra.mrb[0].mxu0 %v590_v9 }
 0x102   : > { %v333_v13 = vpop.f32.mrb[0].mxu0 }
 0x103   : > { %v334_v14 = vadd.f32 %v492_v11, %v333_v13  ;;  %v521_v15 = vpop.f32.mrb[1].mxu0 }
 0x104   : > { %v336_v16 = vpop.f32.mrb[2].mxu0 }
 0x105   : > { %v487_v17 = vpack.c.bf16 %v334_v14, %v334_v14  ;;  %v337_v18 = vadd.f32 %v493_v12, %v336_v16  ;;  %v522_v19 = vpop.f32.mrb[3].mxu0 }
 0x107   : > { %349 = vst.msk [vmem:[%s204_s7] sm:$0xf] %vm348_vm1, %v487_v17  ;;  %v488_v20 = vpack.c.bf16 %v337_v18, %v337_v18 }
 0x109   : > { %350 = vst.msk [vmem:[%s204_s7 + $0x4] sm:$0xf] %vm348_vm1, %v488_v20 }
 0x10a   : > { %604 = shalt.err (!%p601_p5)
}
 0x10b   : > { %s605_s27 = scalar_lea.hbm %s790_s18, 128  ;;  %s609_s30 = scalar_lea.hbm %s841_s3, 256 }
 0x10c   : > { %p606_p6 = scmp.ne.s32.totalorder %s790_s18, %s605_s27  ;;  %p610_p10 = scmp.lt.u32.totalorder %s790_s18, %s841_s3 }
 0x10d   : > { %p611_p11 = scmp.lt.u32.totalorder %s609_s30, %s605_s27  ;;  %p613_p13 = scmp.lt.u32.totalorder %s605_s27, %s790_s18 }
 0x10e   : > { %p607_p7 = pnand %p606_p6, %p736_p4 }
 0x10f   : > { %p612_p12 = por %p611_p11, %p610_p10 }
 0x110   : > { %p608_p9 = pneg %p607_p7 }
 0x111   : > { %p614_p0 = por %p613_p13, %p612_p12 }
 0x113   : > { %p615_p1 = pnand %p614_p0, %p608_p9 }
 0x115   : > { %618 = shalt.err (!%p615_p1)
}
 0x116   : > { %s674_s6 = smov 64   ;;  %s675_s7 = smov 4  }
 0x117   : > { %523 = dma.vmem_to_hbm [thread:$0]  (%p736_p4), %s785_s8, 128, %s790_s18, %s792_s19, %s674_s6, %s674_s6, %s675_s7  }
 0x118 PF: > { %p529_p2 = scmp.ge.s32.totalorder %s669_s17, 2  ;;  %s382_s10 = sand.u32 1, %s649_s12  }
 0x119   : > { %s383_s9 = scalar_lea.sflag [#allocation3], %s382_s10 }
 0x11a   : > { %p526_p3 = pnand %p529_p2, %p743_p8 }
 0x11c   : > { %644 = dma.done.wait (!%p526_p3), %s383_s9, 128  }
 0x11d   : > { %646 = vsyncadd (!%p526_p3), %s383_s9, 4294967168  ;;  %s16_s17 = sadd.s32 1, %s669_s17   ;;  %s844_s12 = smov %s653_s13 }
 0x11e   : > { %p13_p5 = scmp.ge.s32.totalorder %s16_s17, 4   ;;  %s845_s13 = smov %s657_s14 }
 0x11f   : > { %s846_s14 = smov %s749_s25  ;;  %s847_s15 = smov %s665_s16 }
 0x120   : > { %s848_s16 = smov %s850_s20  ;;  %15 = sbr.rel (!%p13_p5) target bundleno = 4 (0x4), region = 70 }
 0x127   :  { %388 = vsyncpa [#allocation3], 1 }
 0x128   :  { %390 = vsyncpa [#allocation3 + $0x1], 1 }

</bundles_post_ra>
